<compile_context>
chip_gen: v7x
topology: tpu7x:2x2x1
jax: 0.10.0
libtpu: 0.0.40
codegen_flags: <defaults>
</compile_context>

<pallas_src>
import functools

import jax
import jax.numpy as jnp
from jax import lax
from jax.experimental import pallas as pl
from jax.experimental.pallas import tpu as pltpu

_LANE = 128
_SUBLANE = 8
_MAX_TILE_M = 512     # rows per batch tile
_TILE_K = 1536        # K tile for large D (150528 = 98 * 1536 for the default module)
_FULL_K_MAX = 2048    # D up to this stays a single K block (no reduction axis work)


def _round_up(x, m):
    return ((x + m - 1) // m) * m


def _choose_tile_m(batch):
    # Split the batch over >= 2 grid steps (so the "parallel" axis can shard
    # across v7x's two TensorCores) while staying sublane-aligned and <= 512.
    half = -(-batch // 2)
    return max(_SUBLANE, min(_MAX_TILE_M, _round_up(half, _SUBLANE)))


def _choose_tile_k(d):
    return d if d <= _FULL_K_MAX else _TILE_K


def prepare_params(weight, bias):
    """One-time parameter prep (hoisted out of the per-call forward path).

    weight: (O, D) -> transposed + zero-padded to (D_pad, O_pad) float32
    bias:   (O,)   -> zero-padded to (1, O_pad) float32
    """
    out_dim, d = weight.shape
    tile_k = _choose_tile_k(d)
    d_pad = _round_up(d, tile_k)
    o_pad = _round_up(out_dim, _LANE)
    w_p = (jnp.zeros((d_pad, o_pad), jnp.float32)
           .at[:d, :out_dim].set(weight.T.astype(jnp.float32)))
    b_p = (jnp.zeros((1, o_pad), jnp.float32)
           .at[0, :out_dim].set(bias.astype(jnp.float32)))
    return w_p, b_p


def _linear_kernel(x_ref, w_ref, b_ref, o_ref, acc_ref, *, n_k, k_rem, need_mask):
    # x_ref: (tile_m, tile_k)  w_ref: (tile_k, O_pad)  b_ref: (1, O_pad)
    # o_ref: (tile_m, O_pad)   acc_ref: (tile_m, O_pad) f32 scratch
    k = pl.program_id(1)

    @pl.when(k == 0)
    def _():
        acc_ref[...] = jnp.zeros_like(acc_ref)

    x = x_ref[...]
    if need_mask:
        # Last (ragged) K block: zero columns past D so out-of-bounds garbage
        # (potentially NaN) can never reach valid output rows.
        col = lax.broadcasted_iota(jnp.int32, x.shape, dimension=1)
        x = jnp.where((k < n_k - 1) | (col < k_rem), x, 0.0)

    acc_ref[...] += jnp.dot(x, w_ref[...], preferred_element_type=jnp.float32)

    @pl.when(k == n_k - 1)
    def _():
        o_ref[...] = (acc_ref[...] + b_ref[...]).astype(o_ref.dtype)


def similarity_head_forward(x_nchw, w_p, b_p, out_dim):
    """Equivalent of SimilarityHead.forward.

    x_nchw: (B, C, H, W) float32
    w_p, b_p: outputs of prepare_params(weight, bias)
    out_dim:  O (true, unpadded output width)
    returns (B, O) float32
    """
    batch = x_nchw.shape[0]
    d = 1
    for s in x_nchw.shape[1:]:
        d *= s
    d_pad, o_pad = w_p.shape

    x_flat = x_nchw.reshape(batch, d)        # torch .view(B, -1); no data movement

    tile_m = _choose_tile_m(batch)
    tile_k = _choose_tile_k(d)
    n_m = -(-batch // tile_m)                # cdiv grid; ragged tail handled by Pallas
    n_k = d_pad // tile_k
    k_rem = d - (n_k - 1) * tile_k
    need_mask = (d % tile_k) != 0

    kernel = functools.partial(_linear_kernel,
                               n_k=n_k, k_rem=k_rem, need_mask=need_mask)

    # TODO(synk): weight/bias blocks with constant index_maps could be marked
    # pipeline_mode=pl.Buffered(1) to drop their second VMEM buffer; omitted
    # here to keep the call maximally portable.
    out_pad = pl.pallas_call(
        kernel,
        out_shape=jax.ShapeDtypeStruct((batch, o_pad), jnp.float32),
        grid_spec=pltpu.PrefetchScalarGridSpec(
            num_scalar_prefetch=0,
            grid=(n_m, n_k),
            in_specs=[
                pl.BlockSpec((tile_m, tile_k), lambda i, k: (i, k)),   # x tile
                pl.BlockSpec((tile_k, o_pad), lambda i, k: (k, 0)),    # W^T tile
                pl.BlockSpec((1, o_pad), lambda i, k: (0, 0)),         # bias (resident)
            ],
            out_specs=pl.BlockSpec((tile_m, o_pad), lambda i, k: (i, 0)),
            scratch_shapes=[pltpu.VMEM((tile_m, o_pad), jnp.float32)],
        ),
        compiler_params=pltpu.CompilerParams(
            dimension_semantics=("parallel", "arbitrary"),
        ),
        cost_estimate=pl.CostEstimate(
            flops=2 * batch * d * o_pad,
            transcendentals=0,
            bytes_accessed=4 * (batch * d + d_pad * o_pad + batch * o_pad),
        ),
    )(x_flat, w_p, b_p)

    return out_pad[:, :out_dim]


if __name__ == "__main__":
    # Small shapes consistent with the module: batch=2, C=3, H=W=16
    # => input_dim = 3*16*16 = 768, output_dim = 15.
    B, C, H, W = 2, 3, 16, 16
    D = C * H * W
    O = 15

    key = jax.random.PRNGKey(0)
    kx, kw, kb = jax.random.split(key, 3)

    x = jax.random.normal(kx, (B, C, H, W), dtype=jnp.float32)

    # Deterministic parameter init mimicking torch.nn.Linear defaults:
    # uniform(-1/sqrt(D), 1/sqrt(D)) for both weight and bias.
    bound = 1.0 / jnp.sqrt(jnp.float32(D))
    weight = jax.random.uniform(kw, (O, D), dtype=jnp.float32,
                                minval=-bound, maxval=bound)
    bias = jax.random.uniform(kb, (O,), dtype=jnp.float32,
                              minval=-bound, maxval=bound)

    # One-time (init-side) parameter layout prep, then the hot-path forward.
    w_p, b_p = prepare_params(weight, bias)
    out = similarity_head_forward(x, w_p, b_p, O)
    out = jax.block_until_ready(out)

    # Reference check against plain JAX.
    ref = x.reshape(B, D) @ weight.T + bias
    assert out.shape == (B, O)
    assert jnp.allclose(out, ref, atol=1e-4, rtol=1e-4)

    print("KERNEL_OK")
</pallas_src>

<mosaic_0001>
module attributes {stable_mosaic.version = 11 : i64} {
  func.func @_linear_kernel(%arg0: i32, %arg1: i32, %arg2: memref<8x768xf32, #tpu.memory_space<vmem>>, %arg3: memref<768x128xf32, #tpu.memory_space<vmem>>, %arg4: memref<1x128xf32, #tpu.memory_space<vmem>>, %arg5: memref<8x128xf32, #tpu.memory_space<vmem>>, %arg6: memref<8x128xf32, #tpu.memory_space<vmem>>) attributes {dimension_semantics = [#tpu.dimension_semantics<parallel>, #tpu.dimension_semantics<arbitrary>], iteration_bounds = array<i64: 1, 1>, scalar_prefetch = 0 : i64, scratch_operands = 1 : i64, tpu.core_type = #tpu.core_type<tc>, window_params = [{transform_indices = @transform_0, window_bounds = array<i64: 8, 768>}, {transform_indices = @transform_1, window_bounds = array<i64: 768, 128>}, {pipeline_mode = #tpu.pipeline_mode<synchronous>, transform_indices = @transform_2, window_bounds = array<i64: 1, 128>}, {transform_indices = @transform_3, window_bounds = array<i64: 8, 128>}]} {
    %c0_i32 = arith.constant 0 : i32
    %0 = arith.cmpi eq, %arg1, %c0_i32 : i32
    %1 = arith.extui %0 : i1 to i32
    %c0_i32_0 = arith.constant 0 : i32
    %2 = arith.cmpi ne, %1, %c0_i32_0 : i32
    scf.if %2 {
      %cst_10 = arith.constant 0.000000e+00 : f32
      %12 = vector.broadcast %cst_10 : f32 to vector<8x128xf32>
      %c0_11 = arith.constant 0 : index
      %c0_12 = arith.constant 0 : index
      %13 = vector.load %arg6[%c0_11, %c0_12] : memref<8x128xf32, #tpu.memory_space<vmem>>, vector<8x128xf32>
      tpu.vector_store %arg6[%c0_11, %c0_12], %12 {strides = array<i32>} : memref<8x128xf32, #tpu.memory_space<vmem>>, vector<8x128xf32>,
    } else {
    }
    %c0 = arith.constant 0 : index
    %c0_1 = arith.constant 0 : index
    %3 = vector.load %arg2[%c0, %c0_1] : memref<8x768xf32, #tpu.memory_space<vmem>>, vector<8x768xf32>
    %c0_2 = arith.constant 0 : index
    %c0_3 = arith.constant 0 : index
    %4 = vector.load %arg6[%c0_2, %c0_3] : memref<8x128xf32, #tpu.memory_space<vmem>>, vector<8x128xf32>
    %c0_4 = arith.constant 0 : index
    %c0_5 = arith.constant 0 : index
    %5 = vector.load %arg3[%c0_4, %c0_5] : memref<768x128xf32, #tpu.memory_space<vmem>>, vector<768x128xf32>
    %cst = arith.constant dense<0.000000e+00> : vector<8x128xf32>
    %6 = tpu.matmul %3, %5, %cst {dimension_numbers = #tpu.dot_dimension_numbers<[1], [0], [0], [1], [0, 0, 1, 1], [], []>} : vector<8x768xf32>, vector<768x128xf32>, vector<8x128xf32> -> vector<8x128xf32>
    %7 = arith.addf %4, %6 : vector<8x128xf32>
    %c0_6 = arith.constant 0 : index
    %c0_7 = arith.constant 0 : index
    %8 = vector.load %arg6[%c0_6, %c0_7] : memref<8x128xf32, #tpu.memory_space<vmem>>, vector<8x128xf32>
    tpu.vector_store %arg6[%c0_6, %c0_7], %7 {strides = array<i32>} : memref<8x128xf32, #tpu.memory_space<vmem>>, vector<8x128xf32>,
    %c0_i32_8 = arith.constant 0 : i32
    %9 = arith.cmpi eq, %arg1, %c0_i32_8 : i32
    %10 = arith.extui %9 : i1 to i32
    %c0_i32_9 = arith.constant 0 : i32
    %11 = arith.cmpi ne, %10, %c0_i32_9 : i32
    scf.if %11 {
      %c0_10 = arith.constant 0 : index
      %c0_11 = arith.constant 0 : index
      %12 = vector.load %arg6[%c0_10, %c0_11] : memref<8x128xf32, #tpu.memory_space<vmem>>, vector<8x128xf32>
      %c0_12 = arith.constant 0 : index
      %c0_13 = arith.constant 0 : index
      %13 = vector.load %arg4[%c0_12, %c0_13] : memref<1x128xf32, #tpu.memory_space<vmem>>, vector<1x128xf32>
      %14 = vector.broadcast %13 : vector<1x128xf32> to vector<8x128xf32>
      %15 = arith.addf %12, %14 : vector<8x128xf32>
      %c0_14 = arith.constant 0 : index
      %c0_15 = arith.constant 0 : index
      %16 = vector.load %arg5[%c0_14, %c0_15] : memref<8x128xf32, #tpu.memory_space<vmem>>, vector<8x128xf32>
      tpu.vector_store %arg5[%c0_14, %c0_15], %15 {strides = array<i32>} : memref<8x128xf32, #tpu.memory_space<vmem>>, vector<8x128xf32>,
    } else {
    }
    return
  }
  func.func @transform_0(%arg0: i32, %arg1: i32) -> (i32, i32) {
    %c0_i32 = arith.constant 0 : i32
    return %arg0, %arg1 : i32, i32
  }
  func.func @transform_1(%arg0: i32, %arg1: i32) -> (i32, i32) {
    %c0_i32 = arith.constant 0 : i32
    %c0_i32_0 = arith.constant 0 : i32
    return %arg1, %c0_i32 : i32, i32
  }
  func.func @transform_2(%arg0: i32, %arg1: i32) -> (i32, i32) {
    %c0_i32 = arith.constant 0 : i32
    %c0_i32_0 = arith.constant 0 : i32
    %c0_i32_1 = arith.constant 0 : i32
    return %c0_i32, %c0_i32_0 : i32, i32
  }
  func.func @transform_3(%arg0: i32, %arg1: i32) -> (i32, i32) {
    %c0_i32 = arith.constant 0 : i32
    %c0_i32_0 = arith.constant 0 : i32
    return %arg0, %c0_i32 : i32, i32
  }
}

</mosaic_0001>

<bundles_post_ra>
// kernel: tpu_custom_call.1
= control target key start
LH: loop header
LB: loop body
LE: loop exit
PB: predicated region body
PF: predicated region fallthrough
CT: control target
= control target key end

     0   :  { %8 = vsyncpa [#allocation4], 0  ;;  %s833_s0 = inlined_call_operand.hbm [shape: f32[2,768], index: 0, kind: input, shape index: {}]   ;;  %s834_s1 = inlined_call_operand.hbm [shape: f32[768,128], index: 1, kind: input, shape index: {}]   ;;  %s835_s2 = inlined_call_operand.vmem [shape: f32[1,128], index: 2, kind: input, shape index: {}]   ;;  %s836_s3 = inlined_call_operand.hbm [shape: f32[2,128], index: 3, kind: output, shape index: {}]  }
   0x1   :  { %9 = vsyncpa [#allocation7], 0 }
   0x2   :  { %10 = vsyncpa [#allocation5], 0 }
   0x3   :  { %15 = vsyncadd [#allocation4], 576  ;;  %s756_s12 = smov [#allocation3]   ;;  %s684_s16 = scalar_lea.hbm %s833_s0, 192 }
   0x4   :  { %s16_s13 = sshll.u32 %s756_s12, 4  ;;  %p685_p0 = scmp.ne.s32.totalorder %s833_s0, %s684_s16  ;;  %s17_s13 = int_to_ptr.vmem [resolvable:$true] %s16_s13 }
   0x5   :  { %p688_p1 = scmp.lt.u32.totalorder %s684_s16, %s833_s0 }
   0x7   :  { %p690_p2 = pnand %p688_p1, %p685_p0 }
   0x9   :  { %693 = shalt.err (!%p690_p2)
}
   0xa   :  { %s694_s21 = scalar_lea.vmem %s17_s13, 192  ;;  %s698_s22 = scalar_lea.vmem %s17_s13, 768 }
   0xb   :  { %p695_p3 = scmp.ne.s32.totalorder %s17_s13, %s694_s21  ;;  %p699_p4 = scmp.lt.s32.totalorder %s17_s13, %s17_s13 }
   0xc   :  { %p700_p5 = scmp.lt.s32.totalorder %s698_s22, %s694_s21 }
   0xe   :  { %p701_p6 = por %p700_p5, %p699_p4 }
  0x10   :  { %p702_p7 = pnand %p701_p6, %p695_p3 }
  0x12   :  { %705 = shalt.err (!%p702_p7)
}
  0x13   :  { %s757_s23 = smov 192   ;;  %s758_s24 = smov 12  }
  0x14   :  { %22 = dma.hbm_to_vmem [thread:$0]  %s833_s0, 192, %s17_s13, [#allocation4], %s757_s23, %s757_s23, %s758_s24  }
  0x15   :  { %s759_s27 = smov [#allocation6]   ;;  %s706_s4 = scalar_lea.hbm %s834_s1, 12288 }
  0x16   :  { %s28_s28 = sshll.u32 %s759_s27, 4  ;;  %p707_p8 = scmp.ne.s32.totalorder %s834_s1, %s706_s4  ;;  %s29_s28 = int_to_ptr.vmem [resolvable:$true] %s28_s28 }
  0x17   :  { %p710_p9 = scmp.lt.u32.totalorder %s706_s4, %s834_s1 }
  0x19   :  { %p712_p10 = pnand %p710_p9, %p707_p8 }
  0x1b   :  { %715 = shalt.err (!%p712_p10)
}
  0x1c   :  { %s716_s9 = scalar_lea.vmem %s29_s28, 12288  ;;  %p721_p12 = scmp.lt.s32.totalorder %s29_s28, %s29_s28 }
  0x1d   :  { %p717_p11 = scmp.ne.s32.totalorder %s29_s28, %s716_s9  ;;  %p722_p13 = scmp.lt.s32.totalorder %s716_s9, %s716_s9 }
  0x1f   :  { %p723_p0 = por %p722_p13, %p721_p12 }
  0x21   :  { %p724_p1 = pnand %p723_p0, %p717_p11 }
  0x23   :  { %727 = shalt.err (!%p724_p1)
}
  0x24   :  { %s760_s0 = smov 128   ;;  %s761_s10 = smov 8  }
  0x25   :  { %34 = dma.hbm_to_vmem [thread:$0]  %s834_s1, 12288, %s29_s28, [#allocation7], %s760_s0, %s760_s0, %s761_s10  }
  0x26   :  { %750 = dma.done.wait [#allocation4], 768  }
  0x27   :  { %751 = vsyncadd [#allocation4], 4294966528 }
  0x28   :  { %752 = dma.done.wait [#allocation7], 12288  }
  0x29   :  { %753 = vsyncadd [#allocation7], 4294955008  ;;  %v73_v0 = vld [vmem:[#allocation6 + $0x80] sm:$0xff]  ;;  %v74_v1 = vld [vmem:[#allocation6 + $0x88] sm:$0xff]  ;;  %v762_v51 = vmov 1983009808   ;;  %v168_v53 = vlaneseq }
  0x2a   :  { %v105_v2 = vld [vmem:[#allocation6 + $0x180] sm:$0xff]  ;;  %v570_v3 = vpack.c.bf16 %v74_v1, %v73_v0  ;;  %v106_v4 = vld [vmem:[#allocation6 + $0x188] sm:$0xff]  ;;  %v75_v11 = vld [vmem:[#allocation6 + $0x90] sm:$0xff]  ;;  %v166_v52 = vunpack.c.l.s4 %v762_v51 }
  0x2b   :  { %v57_v5 = vld [vmem:[#allocation6] sm:$0xff]  ;;  %v58_v6 = vld [vmem:[#allocation6 + $0x8] sm:$0xff]  ;;  %v602_v7 = vpack.c.bf16 %v106_v4, %v105_v2  ;;  %v76_v13 = vld [vmem:[#allocation6 + $0x98] sm:$0xff] }
  0x2c   :  { %v572_v8 = vpack.c.bf16 %v58_v6, %v57_v5  ;;  %v89_v9 = vld [vmem:[#allocation6 + $0x100] sm:$0xff]  ;;  %v90_v10 = vld [vmem:[#allocation6 + $0x108] sm:$0xff]  ;;  %571 = vmatprep.subr.bf16.mxu0 %v570_v3  ;;  %v107_v14 = vld [vmem:[#allocation6 + $0x190] sm:$0xff]  ;;  %v574_v16 = vpack.c.bf16 %v76_v13, %v75_v11  ;;  %v167_v4 = vunpack.c.0.s8 %v166_v52  ;;  %v169_v5 = vshrl.u32 %v168_v53, 7 }
  0x2d   :  { %v604_v12 = vpack.c.bf16 %v90_v10, %v89_v9  ;;  %v108_v15 = vld [vmem:[#allocation6 + $0x198] sm:$0xff]  ;;  %603 = vmatprep.subr.bf16.mxu1 %v602_v7  ;;  %v59_v18 = vld [vmem:[#allocation6 + $0x10] sm:$0xff]  ;;  %v77_v23 = vld [vmem:[#allocation6 + $0xa0] sm:$0xff] }
  0x2e   :  { %573 = vmatpush3.bf16.msra.mxu0 %v572_v8  ;;  %v606_v17 = vpack.c.bf16 %v108_v15, %v107_v14  ;;  %v60_v19 = vld [vmem:[#allocation6 + $0x18] sm:$0xff]  ;;  %v91_v20 = vld [vmem:[#allocation6 + $0x110] sm:$0xff]  ;;  %v78_v24 = vld [vmem:[#allocation6 + $0xa8] sm:$0xff] }
  0x2f   :  { %605 = vmatpush3.bf16.msra.mxu1 %v604_v12  ;;  %v576_v21 = vpack.c.bf16 %v60_v19, %v59_v18  ;;  %v92_v22 = vld [vmem:[#allocation6 + $0x118] sm:$0xff]  ;;  %575 = vmatprep.subr.bf16.mxu0 %v574_v16  ;;  %v578_v26 = vpack.c.bf16 %v78_v24, %v77_v23  ;;  %v109_v27 = vld [vmem:[#allocation6 + $0x1a0] sm:$0xff]  ;;  %v110_v28 = vld [vmem:[#allocation6 + $0x1a8] sm:$0xff] }
  0x30   :  { %607 = vmatprep.subr.bf16.mxu1 %v606_v17  ;;  %v608_v25 = vpack.c.bf16 %v92_v22, %v91_v20  ;;  %v61_v29 = vld [vmem:[#allocation6 + $0x20] sm:$0xff]  ;;  %v610_v30 = vpack.c.bf16 %v110_v28, %v109_v27  ;;  %v62_v31 = vld [vmem:[#allocation6 + $0x28] sm:$0xff]  ;;  %v79_v35 = vld [vmem:[#allocation6 + $0xb0] sm:$0xff]  ;;  %v810_v22 = vsub.s32 %v167_v4, %v169_v5 }
  0x31   :  { %v93_v32 = vld [vmem:[#allocation6 + $0x120] sm:$0xff]  ;;  %v94_v33 = vld [vmem:[#allocation6 + $0x128] sm:$0xff]  ;;  %v580_v34 = vpack.c.bf16 %v62_v31, %v61_v29  ;;  %v80_v36 = vld [vmem:[#allocation6 + $0xb8] sm:$0xff] }
  0x32   :  { %577 = vmatpush3.bf16.msra.mxu0 %v576_v21  ;;  %v111_v37 = vld [vmem:[#allocation6 + $0x1b0] sm:$0xff]  ;;  %v612_v38 = vpack.c.bf16 %v94_v33, %v93_v32  ;;  %v582_v39 = vpack.c.bf16 %v80_v36, %v79_v35  ;;  %v112_v40 = vld [vmem:[#allocation6 + $0x1b8] sm:$0xff]  ;;  %v81_v46 = vld [vmem:[#allocation6 + $0xc0] sm:$0xff] }
  0x33   :  { %609 = vmatpush3.bf16.msra.mxu1 %v608_v25  ;;  %579 = vmatprep.subr.bf16.mxu0 %v578_v26  ;;  %v63_v41 = vld [vmem:[#allocation6 + $0x30] sm:$0xff]  ;;  %v64_v42 = vld [vmem:[#allocation6 + $0x38] sm:$0xff]  ;;  %v614_v43 = vpack.c.bf16 %v112_v40, %v111_v37  ;;  %v82_v47 = vld [vmem:[#allocation6 + $0xc8] sm:$0xff] }
  0x34   :  { %611 = vmatprep.subr.bf16.mxu1 %v610_v30  ;;  %v95_v44 = vld [vmem:[#allocation6 + $0x130] sm:$0xff]  ;;  %v96_v45 = vld [vmem:[#allocation6 + $0x138] sm:$0xff]  ;;  %v113_v48 = vld [vmem:[#allocation6 + $0x1c0] sm:$0xff]  ;;  %v584_v50 = vpack.c.bf16 %v64_v42, %v63_v41  ;;  %v586_v55 = vpack.c.bf16 %v82_v47, %v81_v46 }
  0x35   :  { %v114_v49 = vld [vmem:[#allocation6 + $0x1c8] sm:$0xff]  ;;  %v616_v54 = vpack.c.bf16 %v96_v45, %v95_v44  ;;  %v65_v56 = vld [vmem:[#allocation6 + $0x40] sm:$0xff]  ;;  %v83_v61 = vld [vmem:[#allocation6 + $0xd0] sm:$0xff] }
  0x36   :  { %581 = vmatpush3.bf16.msra.mxu0 %v580_v34  ;;  %v66_v57 = vld [vmem:[#allocation6 + $0x48] sm:$0xff]  ;;  %v97_v58 = vld [vmem:[#allocation6 + $0x140] sm:$0xff]  ;;  %v618_v59 = vpack.c.bf16 %v114_v49, %v113_v48  ;;  %v84_v62 = vld [vmem:[#allocation6 + $0xd8] sm:$0xff] }
  0x37   :  { %613 = vmatpush3.bf16.msra.mxu1 %v612_v38  ;;  %583 = vmatprep.subr.bf16.mxu0 %v582_v39  ;;  %v98_v60 = vld [vmem:[#allocation6 + $0x148] sm:$0xff]  ;;  %v115_v63 = vld [vmem:[#allocation6 + $0x1d0] sm:$0xff]  ;;  %v116_v0 = vld [vmem:[#allocation6 + $0x1d8] sm:$0xff]  ;;  %v588_v1 = vpack.c.bf16 %v66_v57, %v65_v56  ;;  %v590_v7 = vpack.c.bf16 %v84_v62, %v83_v61 }
  0x38   :  { %615 = vmatprep.subr.bf16.mxu1 %v614_v43  ;;  %v67_v2 = vld [vmem:[#allocation6 + $0x50] sm:$0xff]  ;;  %v68_v3 = vld [vmem:[#allocation6 + $0x58] sm:$0xff]  ;;  %v620_v6 = vpack.c.bf16 %v98_v60, %v97_v58  ;;  %v85_v10 = vld [vmem:[#allocation6 + $0xe0] sm:$0xff]  ;;  %v622_v11 = vpack.c.bf16 %v116_v0, %v115_v63 }
  0x39   :  { %v99_v8 = vld [vmem:[#allocation6 + $0x150] sm:$0xff]  ;;  %v100_v9 = vld [vmem:[#allocation6 + $0x158] sm:$0xff]  ;;  %v86_v12 = vld [vmem:[#allocation6 + $0xe8] sm:$0xff]  ;;  %v592_v18 = vpack.c.bf16 %v68_v3, %v67_v2 }
  0x3a   :  { %585 = vmatpush3.bf16.msra.mxu0 %v584_v50  ;;  %v117_v13 = vld [vmem:[#allocation6 + $0x1e0] sm:$0xff]  ;;  %v118_v14 = vld [vmem:[#allocation6 + $0x1e8] sm:$0xff]  ;;  %v87_v20 = vld [vmem:[#allocation6 + $0xf0] sm:$0xff]  ;;  %v624_v23 = vpack.c.bf16 %v100_v9, %v99_v8  ;;  %v594_v24 = vpack.c.bf16 %v86_v12, %v85_v10 }
  0x3b   :  { %617 = vmatpush3.bf16.msra.mxu1 %v616_v54  ;;  %587 = vmatprep.subr.bf16.mxu0 %v586_v55  ;;  %v69_v15 = vld [vmem:[#allocation6 + $0x60] sm:$0xff]  ;;  %v70_v16 = vld [vmem:[#allocation6 + $0x68] sm:$0xff]  ;;  %v88_v21 = vld [vmem:[#allocation6 + $0xf8] sm:$0xff]  ;;  %v626_v27 = vpack.c.bf16 %v118_v14, %v117_v13 }
  0x3c   :  { %619 = vmatprep.subr.bf16.mxu1 %v618_v59  ;;  %v101_v17 = vld [vmem:[#allocation6 + $0x160] sm:$0xff]  ;;  %v102_v19 = vld [vmem:[#allocation6 + $0x168] sm:$0xff]  ;;  %v119_v25 = vld [vmem:[#allocation6 + $0x1f0] sm:$0xff]  ;;  %v596_v32 = vpack.c.bf16 %v70_v16, %v69_v15  ;;  %v598_v34 = vpack.c.bf16 %v88_v21, %v87_v20 }
  0x3d   :  { %v120_v26 = vld [vmem:[#allocation6 + $0x1f8] sm:$0xff]  ;;  %v678_v29 = vld [vmem:[#allocation3 + $0x18] ss:$12 sps:$4 sm:$0xff]   ;;  %v628_v33 = vpack.c.bf16 %v102_v19, %v101_v17  ;;  %v137_v44 = vld [vmem:[#allocation6 + $0x280] sm:$0xff] }
  0x3e   :  { %589 = vmatpush3.bf16.msra.mxu0 %v588_v1  ;;  %v676_v28 = vld [vmem:[#allocation3] ss:$12 sps:$4 sm:$0xff]   ;;  %v680_v30 = vld [vmem:[#allocation3 + $0x4] ss:$12 sps:$4 sm:$0xff]   ;;  %v681_v31 = vld [vmem:[#allocation3 + $0x1c] ss:$12 sps:$4 sm:$0xff]   ;;  %v185_v39 = vrot.slane %v678_v29, %v810_v22  ;;  %v630_v42 = vpack.c.bf16 %v120_v26, %v119_v25 }
  0x3f   :  { %621 = vmatpush3.bf16.msra.mxu1 %v620_v6  ;;  %591 = vmatprep.subr.bf16.mxu0 %v590_v7  ;;  %v171_v35 = vrot.slane %v676_v28, %v810_v22  ;;  %v71_v36 = vld [vmem:[#allocation6 + $0x70] sm:$0xff]  ;;  %v72_v37 = vld [vmem:[#allocation6 + $0x78] sm:$0xff]  ;;  %v178_v40 = vrot.slane %v680_v30, %v810_v22  ;;  %v192_v41 = vrot.slane %v681_v31, %v810_v22  ;;  %v138_v45 = vld [vmem:[#allocation6 + $0x288] sm:$0xff] }
  0x40   :  { %623 = vmatprep.subr.bf16.mxu1 %v622_v11  ;;  %v103_v38 = vld [vmem:[#allocation6 + $0x170] sm:$0xff]  ;;  %v104_v43 = vld [vmem:[#allocation6 + $0x178] sm:$0xff]  ;;  %v600_v48 = vpack.c.bf16 %v72_v37, %v71_v36  ;;  %v634_v50 = vpack.c.bf16 %v138_v45, %v137_v44  ;;  %v121_v51 = vld [vmem:[#allocation6 + $0x200] sm:$0xff] }
  0x41   :  { %v194_v46 = vcombine.high %v171_v35, %v185_v39  ;;  %v196_v47 = vcombine.high %v178_v40, %v192_v41  ;;  %v632_v49 = vpack.c.bf16 %v104_v43, %v103_v38  ;;  %v122_v52 = vld [vmem:[#allocation6 + $0x208] sm:$0xff]  ;;  %v139_v53 = vld [vmem:[#allocation6 + $0x290] sm:$0xff]  ;;  %v140_v54 = vld [vmem:[#allocation6 + $0x298] sm:$0xff]  ;;  %v193_v55 = vcombine.low %v171_v35, %v185_v39 }
  0x42   :  { %593 = vmatpush3.bf16.msra.mxu0 %v592_v18  ;;  %v195_v56 = vcombine.low %v178_v40, %v192_v41  ;;  %v636_v57 = vpack.c.bf16 %v122_v52, %v121_v51  ;;  %v638_v58 = vpack.c.bf16 %v140_v54, %v139_v53  ;;  %v123_v59 = vld [vmem:[#allocation6 + $0x210] sm:$0xff]  ;;  %v124_v60 = vld [vmem:[#allocation6 + $0x218] sm:$0xff]  ;;  %v141_v61 = vld [vmem:[#allocation6 + $0x2a0] sm:$0xff] }
  0x43   :  { %625 = vmatpush3.bf16.msra.mxu1 %v624_v23  ;;  %595 = vmatprep.subr.bf16.mxu0 %v594_v24  ;;  %v142_v62 = vld [vmem:[#allocation6 + $0x2a8] sm:$0xff]  ;;  %v640_v63 = vpack.c.bf16 %v124_v60, %v123_v59  ;;  %v682_v0 = vld [vmem:[#allocation3 + $0x8] ss:$12 sps:$4 sm:$0xff]   ;;  %v683_v1 = vld [vmem:[#allocation3 + $0x20] ss:$12 sps:$4 sm:$0xff]  }
  0x44   :  { %627 = vmatprep.subr.bf16.mxu1 %v626_v27  ;;  %285 = vmatprep.mubr.f32.mxu0 %v194_v46  ;;  %v642_v2 = vpack.c.bf16 %v142_v62, %v141_v61  ;;  %v125_v3 = vld [vmem:[#allocation6 + $0x220] sm:$0xff]  ;;  %v126_v4 = vld [vmem:[#allocation6 + $0x228] sm:$0xff]  ;;  %v143_v5 = vld [vmem:[#allocation6 + $0x2b0] sm:$0xff]  ;;  %v205_v7 = vrot.slane %v682_v0, %v810_v22  ;;  %v212_v8 = vrot.slane %v683_v1, %v810_v22 }
  0x45   :  { %355 = vmatprep.mubr.f32.mxu1 %v196_v47  ;;  %v144_v6 = vld [vmem:[#allocation6 + $0x2b8] sm:$0xff]  ;;  %v644_v9 = vpack.c.bf16 %v126_v4, %v125_v3  ;;  %v127_v12 = vld [vmem:[#allocation6 + $0x230] sm:$0xff]  ;;  %v145_v14 = vld [vmem:[#allocation6 + $0x2c0] sm:$0xff] }
  0x46   :  { %597 = vmatpush3.bf16.msra.mxu0 %v596_v32  ;;  %v214_v10 = vcombine.high %v205_v7, %v212_v8  ;;  %v646_v11 = vpack.c.bf16 %v144_v6, %v143_v5  ;;  %v128_v13 = vld [vmem:[#allocation6 + $0x238] sm:$0xff]  ;;  %v146_v15 = vld [vmem:[#allocation6 + $0x2c8] sm:$0xff]  ;;  %v129_v18 = vld [vmem:[#allocation6 + $0x240] sm:$0xff]  ;;  %v213_v39 = vcombine.low %v205_v7, %v212_v8 }
  0x47   :  { %629 = vmatpush3.bf16.msra.mxu1 %v628_v33  ;;  %599 = vmatprep.subr.bf16.mxu0 %v598_v34  ;;  %v648_v16 = vpack.c.bf16 %v128_v13, %v127_v12  ;;  %v650_v17 = vpack.c.bf16 %v146_v15, %v145_v14  ;;  %v130_v19 = vld [vmem:[#allocation6 + $0x248] sm:$0xff]  ;;  %v147_v20 = vld [vmem:[#allocation6 + $0x2d0] sm:$0xff]  ;;  %v148_v21 = vld [vmem:[#allocation6 + $0x2d8] sm:$0xff] }
  0x48   :  { %631 = vmatprep.subr.bf16.mxu1 %v630_v42  ;;  %v652_v22 = vpack.c.bf16 %v130_v19, %v129_v18  ;;  %v654_v23 = vpack.c.bf16 %v148_v21, %v147_v20  ;;  %v131_v24 = vld [vmem:[#allocation6 + $0x250] sm:$0xff]  ;;  %v132_v25 = vld [vmem:[#allocation6 + $0x258] sm:$0xff]  ;;  %v149_v26 = vld [vmem:[#allocation6 + $0x2e0] sm:$0xff] }
  0x49   :  { %v150_v27 = vld [vmem:[#allocation6 + $0x2e8] sm:$0xff]  ;;  %v656_v28 = vpack.c.bf16 %v132_v25, %v131_v24  ;;  %v133_v30 = vld [vmem:[#allocation6 + $0x260] sm:$0xff]  ;;  %v151_v32 = vld [vmem:[#allocation6 + $0x2f0] sm:$0xff] }
  0x4a   :  { %601 = vmatpush3.bf16.msra.mxu0 %v600_v48  ;;  %v658_v29 = vpack.c.bf16 %v150_v27, %v149_v26  ;;  %v134_v31 = vld [vmem:[#allocation6 + $0x268] sm:$0xff]  ;;  %v152_v33 = vld [vmem:[#allocation6 + $0x2f8] sm:$0xff]  ;;  %v135_v36 = vld [vmem:[#allocation6 + $0x270] sm:$0xff] }
  0x4b   :  { %633 = vmatpush3.bf16.msra.mxu1 %v632_v49  ;;  %635 = vmatprep.subr.bf16.mxu0 %v634_v50  ;;  %v660_v34 = vpack.c.bf16 %v134_v31, %v133_v30  ;;  %v662_v35 = vpack.c.bf16 %v152_v33, %v151_v32  ;;  %v136_v37 = vld [vmem:[#allocation6 + $0x278] sm:$0xff]  ;;  %v464_v50 = vld [vmem:[%s835_s2] ss:$0 sm:$0xff] }
  0x4c   :  { %v664_v38 = vpack.c.bf16 %v136_v37, %v135_v36 }
  0x4d   :  { %286 = vmatmul.mubr.f32.vlgmr.msra.gmra.mrb[0].mxu0 %v193_v55 }
  0x4e   :  { %356 = vmatmul.mubr.f32.vlgmr.msra.gmra.mrb[0].mxu1 %v195_v56  ;;  %637 = vmatpush3.bf16.msra.mxu0 %v636_v57 }
  0x4f   :  { %639 = vmatprep.subr.bf16.mxu0 %v638_v58  ;;  %425 = vmatprep.mubr.f32.mxu0 %v214_v10 }
  0x52   :  { %641 = vmatpush3.bf16.msra.mxu0 %v640_v63 }
  0x53   :  { %643 = vmatprep.subr.bf16.mxu0 %v642_v2 }
  0x56   :  { %645 = vmatpush3.bf16.msra.mxu0 %v644_v9 }
  0x57   :  { %647 = vmatprep.subr.bf16.mxu0 %v646_v11 }
  0x5a   :  { %649 = vmatpush3.bf16.msra.mxu0 %v648_v16 }
  0x5b   :  { %651 = vmatprep.subr.bf16.mxu0 %v650_v17 }
  0x5e   :  { %653 = vmatpush3.bf16.msra.mxu0 %v652_v22 }
  0x5f   :  { %655 = vmatprep.subr.bf16.mxu0 %v654_v23 }
  0x62   :  { %657 = vmatpush3.bf16.msra.mxu0 %v656_v28 }
  0x63   :  { %659 = vmatprep.subr.bf16.mxu0 %v658_v29 }
  0x66   :  { %661 = vmatpush3.bf16.msra.mxu0 %v660_v34 }
  0x67   :  { %663 = vmatprep.subr.bf16.mxu0 %v662_v35 }
  0x6a   :  { %665 = vmatpush3.bf16.msra.mxu0 %v664_v38 }
  0x6d   :  { %426 = vmatmul.mubr.f32.vlgmr.msra.gmra.mrb[2].mxu0 %v213_v39 }
 0x120   :  { %v497_v40 = vpop.f32.mrb[0].mxu0 }
 0x121   :  { %v532_v41 = vpop.f32.mrb[0].mxu1  ;;  %v498_v42 = vpop.f32.mrb[1].mxu0 }
 0x122   :  { %v499_v43 = vadd.f32 %v498_v42, %v497_v40  ;;  %v533_v44 = vpop.f32.mrb[1].mxu1 }
 0x123   :  { %v534_v45 = vadd.f32 %v533_v44, %v532_v41 }
 0x125   :  { %v358_v46 = vadd.f32 %v534_v45, %v499_v43 }
 0x140   :  { %v567_v47 = vpop.f32.mrb[2].mxu0 }
 0x141   :  { %v568_v48 = vpop.f32.mrb[3].mxu0 }
 0x142   :  { %v569_v49 = vadd.f32 %v568_v48, %v567_v47 }
 0x144   :  { %v428_v51 = vadd.f32 %v569_v49, %v358_v46 }
 0x146   :  { %v444_v52 = vadd.f32 %v464_v50, %v428_v51 }
 0x148   :  { %445 = vst [vmem:[#allocation8] sm:$0xff] %v444_v52 }
 0x149   :  { %450 = vsyncadd [#allocation5], 96  ;;  %s763_s14 = smov [#allocation8]  }
 0x14a   :  { %s451_s15 = sshll.u32 %s763_s14, 4  ;;  %s452_s15 = int_to_ptr.vmem [resolvable:$true] %s451_s15 }
 0x14b   :  { %s728_s16 = scalar_lea.vmem %s452_s15, 32  ;;  %s732_s17 = scalar_lea.vmem %s452_s15, 128 }
 0x14c   :  { %p729_p2 = scmp.ne.s32.totalorder %s452_s15, %s728_s16  ;;  %p733_p3 = scmp.lt.s32.totalorder %s452_s15, %s452_s15 }
 0x14d   :  { %p734_p4 = scmp.lt.s32.totalorder %s732_s17, %s728_s16 }
 0x14f   :  { %p735_p5 = por %p734_p4, %p733_p3 }
 0x151   :  { %p736_p6 = pnand %p735_p5, %p729_p2 }
 0x153   :  { %739 = shalt.err (!%p736_p6)
}
 0x154   :  { %s740_s20 = scalar_lea.hbm %s836_s3, 32 }
 0x155   :  { %p741_p7 = scmp.ne.s32.totalorder %s836_s3, %s740_s20  ;;  %p744_p8 = scmp.lt.u32.totalorder %s740_s20, %s836_s3 }
 0x157   :  { %p746_p9 = pnand %p744_p8, %p741_p7 }
 0x159   :  { %749 = shalt.err (!%p746_p9)
}
 0x15a   :  { %s764_s24 = smov 32   ;;  %s765_s25 = smov 2  }
 0x15b   :  { %457 = dma.vmem_to_hbm [thread:$0]  %s452_s15, 32, %s836_s3, [#allocation5], %s764_s24, %s764_s24, %s765_s25  }
 0x15c   :  { %754 = dma.done.wait [#allocation5], 128  }
 0x15d   :  { %755 = vsyncadd [#allocation5], 4294967168 }
 0x15e   :  { %461 = vsyncpa [#allocation4], 1 }
 0x15f   :  { %462 = vsyncpa [#allocation7], 1 }
 0x160   :  { %463 = vsyncpa [#allocation5], 1 }

</bundles_post_ra>
